<compile_context>
chip_gen: v7x
topology: tpu7x:2x2x1
jax: 0.10.0
libtpu: 0.0.40
codegen_flags: <defaults>
</compile_context>

<pallas_src>
import functools

import jax
import jax.numpy as jnp
from jax.experimental import pallas as pl
from jax.experimental.pallas import tpu as pltpu

_TARGET_BLOCK_BYTES = 4 * 1024 * 1024     # per-input block (x2 inputs x2 buffers = 16 MiB)
_VMEM_LIMIT_BYTES = 40 * 1024 * 1024      # safe scoped limit on v5e / v6e / v7x
_LANE_CHOICES = (512, 256, 128)           # lane-dense minor dims (multiples of 128)


def _nse_kernel(shift_ref, yp_ref, yt_ref, out_ref, *, lanes: int, chunks: int, unroll):
    """Accumulate shifted partial sums for one fully in-bounds (tm, lanes) block.

    out_ref block is (3, 8, lanes), revisited across the whole grid:
      out_ref[0] += row-group sums of (y_true - shift)
      out_ref[1] += row-group sums of (y_true - shift)^2
      out_ref[2] += row-group sums of (y_pred - y_true)^2
    """
    i = pl.program_id(0)

    @pl.when(i == 0)
    def _():
        out_ref[...] = jnp.zeros_like(out_ref)

    s = shift_ref[0]  # SMEM scalar

    def body(c, carry):
        a1, a2, a3 = carry
        r = pl.multiple_of(c * 8, 8)
        yt = yt_ref[pl.ds(r, 8), :].astype(jnp.float32)
        yp = yp_ref[pl.ds(r, 8), :].astype(jnp.float32)
        ytc = yt - s
        diff = yp - yt
        return (a1 + ytc, a2 + ytc * ytc, a3 + diff * diff)

    zero = jnp.zeros((8, lanes), jnp.float32)
    a1, a2, a3 = jax.lax.fori_loop(0, chunks, body, (zero, zero, zero), unroll=unroll)

    out_ref[0] += a1
    out_ref[1] += a2
    out_ref[2] += a3


def _partial_sums_jnp(y_pred, y_true, shift):
    """[sum(yt - s), sum((yt - s)^2), sum((yp - yt)^2)] with plain jnp (small data only)."""
    yt = y_true.astype(jnp.float32).reshape(-1)
    yp = y_pred.astype(jnp.float32).reshape(-1)
    ytc = yt - shift
    diff = yp - yt
    return jnp.stack([jnp.sum(ytc), jnp.sum(ytc * ytc), jnp.sum(diff * diff)])


def _finalize(sums, n_total: int, eps):
    n = jnp.float32(n_total)
    mean_c = sums[0] / n
    # Unbiased (ddof=1) variance from shifted sums; clamp tiny negative rounding.
    var = jnp.maximum((sums[1] - n * mean_c * mean_c) / (n - jnp.float32(1.0)), 0.0)
    q_std = jnp.sqrt(var)
    w = jnp.float32(1.0) / (q_std + jnp.float32(eps)) ** 2
    return w * sums[2] / n


def nse_loss(y_pred: jax.Array, y_true: jax.Array, eps: float = 0.1) -> jax.Array:
    assert y_pred.shape == y_true.shape
    if y_pred.dtype != y_true.dtype:
        common = jnp.promote_types(y_pred.dtype, y_true.dtype)
        y_pred = y_pred.astype(common)
        y_true = y_true.astype(common)
    if y_true.dtype == jnp.float64:  # Mosaic has no f64 path; only hit with x64 enabled.
        y_pred = y_pred.astype(jnp.float32)
        y_true = y_true.astype(jnp.float32)

    n_total = int(y_true.size)
    flat_t = y_true.reshape(-1)
    flat_p = y_pred.reshape(-1)
    # Shift for the well-conditioned (shifted) variance.
    shift = flat_t[0].astype(jnp.float32)

    # ---- choose a copy-free 2-D lane view ----------------------------------
    lanes = None
    for cand in _LANE_CHOICES:
        if n_total % cand == 0:
            lanes = cand
            break
    if lanes is None and y_true.ndim >= 2:
        lanes = int(y_true.shape[-1])  # full-extent lane block (no 128-divisibility needed)

    itemsize = y_true.dtype.itemsize
    if lanes is None or lanes * itemsize * 8 > _TARGET_BLOCK_BYTES:
        # TODO(synk): 1-D non-128-divisible sizes (or absurdly wide rows) fall back to jnp.
        return _finalize(_partial_sums_jnp(flat_p, flat_t, shift), n_total, eps)

    rows = n_total // lanes                      # exact: lanes divides n_total by construction

    # ---- tile size from a per-block VMEM budget -----------------------------
    tm_cap = max(8, (_TARGET_BLOCK_BYTES // (lanes * itemsize)) // 8 * 8)
    nb_target = -(-rows // tm_cap)               # cdiv
    tm = ((rows // nb_target) // 8) * 8
    if tm < 8:
        # Small-input fast path: cheaper than per-call / per-step kernel overheads.
        return _finalize(_partial_sums_jnp(flat_p, flat_t, shift), n_total, eps)

    grid_n = rows // tm                          # only fully in-bounds blocks are visited
    tail_start = grid_n * tm                     # < tm leftover rows handled below in jnp

    yt2 = flat_t.reshape(rows, lanes)            # free reshapes (contiguous), no pad/concat
    yp2 = flat_p.reshape(rows, lanes)
    shift_arr = shift.reshape(1)

    chunks = tm // 8
    unroll = True if chunks <= 8 else 8
    kern = functools.partial(_nse_kernel, lanes=lanes, chunks=chunks, unroll=unroll)

    parts = pl.pallas_call(
        kern,
        out_shape=jax.ShapeDtypeStruct((3, 8, lanes), jnp.float32),
        grid=(grid_n,),
        in_specs=[
            pl.BlockSpec(memory_space=pltpu.MemorySpace.SMEM),      # shift scalar, (1,) f32
            pl.BlockSpec((tm, lanes), lambda i: (i, 0)),            # y_pred block
            pl.BlockSpec((tm, lanes), lambda i: (i, 0)),            # y_true block
        ],
        out_specs=pl.BlockSpec((3, 8, lanes), lambda i: (0, 0, 0)),  # revisited accumulator
        compiler_params=pltpu.CompilerParams(
            dimension_semantics=("arbitrary",),
            vmem_limit_bytes=_VMEM_LIMIT_BYTES,
        ),
    )(shift_arr, yp2, yt2)

    sums = jnp.sum(parts, axis=(1, 2))           # tiny finalize reduction in XLA
    if tail_start < rows:                        # tiny row tail (< tm rows), no kernel pad
        sums = sums + _partial_sums_jnp(yp2[tail_start:], yt2[tail_start:], shift)
    return _finalize(sums, n_total, eps)


def _nse_loss_ref(y_pred, y_true, eps=0.1):
    q_std = jnp.std(y_true, ddof=1)
    se = (y_pred - y_true) ** 2
    w = 1.0 / (q_std + eps) ** 2
    return jnp.mean(w * se)


if __name__ == "__main__":
    key = jax.random.PRNGKey(0)
    k1, k2 = jax.random.split(key)
    B, T = 40, 256  # small (basins, timesteps) discharge sequences
    y_true = jax.random.normal(k1, (B, T), dtype=jnp.float32) * 2.0 + 1.0
    y_pred = y_true + 0.3 * jax.random.normal(k2, (B, T), dtype=jnp.float32)

    loss = jax.block_until_ready(nse_loss(y_pred, y_true, eps=0.1))
    ref = jax.block_until_ready(_nse_loss_ref(y_pred, y_true, eps=0.1))
    assert jnp.allclose(loss, ref, rtol=1e-4, atol=1e-6), (loss, ref)
    print("KERNEL_OK")
</pallas_src>

<mosaic_0001>
module attributes {stable_mosaic.version = 11 : i64} {
  func.func @_nse_kernel(%arg0: i32, %arg1: memref<1xf32, #tpu.memory_space<smem>>, %arg2: memref<16x512xf32, #tpu.memory_space<vmem>>, %arg3: memref<16x512xf32, #tpu.memory_space<vmem>>, %arg4: memref<3x8x512xf32, #tpu.memory_space<vmem>>) attributes {dimension_semantics = [#tpu.dimension_semantics<arbitrary>], iteration_bounds = array<i64: 1>, scalar_prefetch = 0 : i64, scratch_operands = 0 : i64, tpu.core_type = #tpu.core_type<tc>, window_params = [{transform_indices = @transform_0, window_bounds = array<i64: 1>}, {transform_indices = @transform_1, window_bounds = array<i64: 16, 512>}, {transform_indices = @transform_2, window_bounds = array<i64: 16, 512>}, {pipeline_mode = #tpu.pipeline_mode<synchronous>, transform_indices = @transform_3, window_bounds = array<i64: 3, 8, 512>}]} {
    %c0_i32 = arith.constant 0 : i32
    %0 = arith.cmpi eq, %arg0, %c0_i32 : i32
    %1 = arith.extui %0 : i1 to i32
    %c0_i32_0 = arith.constant 0 : i32
    %2 = arith.cmpi ne, %1, %c0_i32_0 : i32
    scf.if %2 {
      %cst_23 = arith.constant 0.000000e+00 : f32
      %51 = vector.broadcast %cst_23 : f32 to vector<3x8x512xf32>
      %c0_24 = arith.constant 0 : index
      %c0_25 = arith.constant 0 : index
      %c0_26 = arith.constant 0 : index
      %52 = vector.load %arg4[%c0_24, %c0_25, %c0_26] : memref<3x8x512xf32, #tpu.memory_space<vmem>>, vector<3x8x512xf32>
      tpu.vector_store %arg4[%c0_24, %c0_25, %c0_26], %51 {strides = array<i32>} : memref<3x8x512xf32, #tpu.memory_space<vmem>>, vector<3x8x512xf32>,
    } else {
    }
    %c0 = arith.constant 0 : index
    %3 = memref.load %arg1[%c0] : memref<1xf32, #tpu.memory_space<smem>>
    %cst = arith.constant 0.000000e+00 : f32
    %4 = vector.broadcast %cst : f32 to vector<8x512xf32>
    %c0_i32_1 = arith.constant 0 : i32
    %c8_i32 = arith.constant 8 : i32
    %5 = arith.muli %c0_i32_1, %c8_i32 : i32
    %6 = tpu.assume_multiple %5, 8 : i32
    %7 = arith.index_cast %6 : i32 to index
    %c0_2 = arith.constant 0 : index
    %8 = vector.load %arg3[%7, %c0_2] : memref<16x512xf32, #tpu.memory_space<vmem>>, vector<8x512xf32>
    %9 = arith.index_cast %6 : i32 to index
    %c0_3 = arith.constant 0 : index
    %10 = vector.load %arg2[%9, %c0_3] : memref<16x512xf32, #tpu.memory_space<vmem>>, vector<8x512xf32>
    %11 = vector.broadcast %3 : f32 to vector<8x512xf32>
    %12 = arith.subf %8, %11 : vector<8x512xf32>
    %13 = arith.subf %10, %8 : vector<8x512xf32>
    %14 = arith.addf %4, %12 : vector<8x512xf32>
    %15 = arith.mulf %12, %12 : vector<8x512xf32>
    %16 = arith.addf %4, %15 : vector<8x512xf32>
    %17 = arith.mulf %13, %13 : vector<8x512xf32>
    %18 = arith.addf %4, %17 : vector<8x512xf32>
    %c1_i32 = arith.constant 1 : i32
    %c8_i32_4 = arith.constant 8 : i32
    %19 = arith.muli %c1_i32, %c8_i32_4 : i32
    %20 = tpu.assume_multiple %19, 8 : i32
    %21 = arith.index_cast %20 : i32 to index
    %c0_5 = arith.constant 0 : index
    %22 = vector.load %arg3[%21, %c0_5] : memref<16x512xf32, #tpu.memory_space<vmem>>, vector<8x512xf32>
    %23 = arith.index_cast %20 : i32 to index
    %c0_6 = arith.constant 0 : index
    %24 = vector.load %arg2[%23, %c0_6] : memref<16x512xf32, #tpu.memory_space<vmem>>, vector<8x512xf32>
    %25 = vector.broadcast %3 : f32 to vector<8x512xf32>
    %26 = arith.subf %22, %25 : vector<8x512xf32>
    %27 = arith.subf %24, %22 : vector<8x512xf32>
    %28 = arith.addf %14, %26 : vector<8x512xf32>
    %29 = arith.mulf %26, %26 : vector<8x512xf32>
    %30 = arith.addf %16, %29 : vector<8x512xf32>
    %31 = arith.mulf %27, %27 : vector<8x512xf32>
    %32 = arith.addf %18, %31 : vector<8x512xf32>
    %c2_i32 = arith.constant 2 : i32
    %c0_7 = arith.constant 0 : index
    %c0_8 = arith.constant 0 : index
    %c0_9 = arith.constant 0 : index
    %33 = vector.load %arg4[%c0_7, %c0_8, %c0_9] : memref<3x8x512xf32, #tpu.memory_space<vmem>>, vector<1x8x512xf32>
    %34 = vector.shape_cast %33 : vector<1x8x512xf32> to vector<8x512xf32>
    %35 = arith.addf %34, %28 : vector<8x512xf32>
    %c0_10 = arith.constant 0 : index
    %c0_11 = arith.constant 0 : index
    %c0_12 = arith.constant 0 : index
    %36 = vector.load %arg4[%c0_10, %c0_11, %c0_12] : memref<3x8x512xf32, #tpu.memory_space<vmem>>, vector<1x8x512xf32>
    %37 = vector.shape_cast %36 : vector<1x8x512xf32> to vector<8x512xf32>
    %38 = vector.shape_cast %35 : vector<8x512xf32> to vector<1x8x512xf32>
    tpu.vector_store %arg4[%c0_10, %c0_11, %c0_12], %38 {strides = array<i32>} : memref<3x8x512xf32, #tpu.memory_space<vmem>>, vector<1x8x512xf32>,
    %c1 = arith.constant 1 : index
    %c0_13 = arith.constant 0 : index
    %c0_14 = arith.constant 0 : index
    %39 = vector.load %arg4[%c1, %c0_13, %c0_14] : memref<3x8x512xf32, #tpu.memory_space<vmem>>, vector<1x8x512xf32>
    %40 = vector.shape_cast %39 : vector<1x8x512xf32> to vector<8x512xf32>
    %41 = arith.addf %40, %30 : vector<8x512xf32>
    %c1_15 = arith.constant 1 : index
    %c0_16 = arith.constant 0 : index
    %c0_17 = arith.constant 0 : index
    %42 = vector.load %arg4[%c1_15, %c0_16, %c0_17] : memref<3x8x512xf32, #tpu.memory_space<vmem>>, vector<1x8x512xf32>
    %43 = vector.shape_cast %42 : vector<1x8x512xf32> to vector<8x512xf32>
    %44 = vector.shape_cast %41 : vector<8x512xf32> to vector<1x8x512xf32>
    tpu.vector_store %arg4[%c1_15, %c0_16, %c0_17], %44 {strides = array<i32>} : memref<3x8x512xf32, #tpu.memory_space<vmem>>, vector<1x8x512xf32>,
    %c2 = arith.constant 2 : index
    %c0_18 = arith.constant 0 : index
    %c0_19 = arith.constant 0 : index
    %45 = vector.load %arg4[%c2, %c0_18, %c0_19] : memref<3x8x512xf32, #tpu.memory_space<vmem>>, vector<1x8x512xf32>
    %46 = vector.shape_cast %45 : vector<1x8x512xf32> to vector<8x512xf32>
    %47 = arith.addf %46, %32 : vector<8x512xf32>
    %c2_20 = arith.constant 2 : index
    %c0_21 = arith.constant 0 : index
    %c0_22 = arith.constant 0 : index
    %48 = vector.load %arg4[%c2_20, %c0_21, %c0_22] : memref<3x8x512xf32, #tpu.memory_space<vmem>>, vector<1x8x512xf32>
    %49 = vector.shape_cast %48 : vector<1x8x512xf32> to vector<8x512xf32>
    %50 = vector.shape_cast %47 : vector<8x512xf32> to vector<1x8x512xf32>
    tpu.vector_store %arg4[%c2_20, %c0_21, %c0_22], %50 {strides = array<i32>} : memref<3x8x512xf32, #tpu.memory_space<vmem>>, vector<1x8x512xf32>,
    return
  }
  func.func @transform_0(%arg0: i32) -> i32 {
    %c0_i32 = arith.constant 0 : i32
    %c0_i32_0 = arith.constant 0 : i32
    return %c0_i32 : i32
  }
  func.func @transform_1(%arg0: i32) -> (i32, i32) {
    %c0_i32 = arith.constant 0 : i32
    %c0_i32_0 = arith.constant 0 : i32
    return %arg0, %c0_i32 : i32, i32
  }
  func.func @transform_2(%arg0: i32) -> (i32, i32) {
    %c0_i32 = arith.constant 0 : i32
    %c0_i32_0 = arith.constant 0 : i32
    return %arg0, %c0_i32 : i32, i32
  }
  func.func @transform_3(%arg0: i32) -> (i32, i32, i32) {
    %c0_i32 = arith.constant 0 : i32
    %c0_i32_0 = arith.constant 0 : i32
    %c0_i32_1 = arith.constant 0 : i32
    %c0_i32_2 = arith.constant 0 : i32
    return %c0_i32, %c0_i32_0, %c0_i32_1 : i32, i32, i32
  }
}

</mosaic_0001>

<bundles_post_ra>
// kernel: tpu_custom_call.1
= control target key start
LH: loop header
LB: loop body
LE: loop exit
PB: predicated region body
PF: predicated region fallthrough
CT: control target
= control target key end

     0   :  { %9 = vsyncpa [#allocation4], 0  ;;  %s359_s0 = inlined_call_operand.<no memory space> [shape: f32[1], index: 0, kind: input, shape index: {}]   ;;  %s360_s1 = inlined_call_operand.hbm [shape: f32[20,512], index: 1, kind: input, shape index: {}]   ;;  %s361_s2 = inlined_call_operand.hbm [shape: f32[20,512], index: 2, kind: input, shape index: {}]   ;;  %s362_s3 = inlined_call_operand.hbm [shape: f32[3,8,512], index: 3, kind: output, shape index: {}]  }
   0x1   :  { %10 = vsyncpa [#allocation7], 0 }
   0x2   :  { %11 = vsyncpa [#allocation5], 0  ;;  %s280_s12 = smov [#allocation3]   ;;  %s208_s16 = scalar_lea.hbm %s360_s1, 1024 }
   0x3   :  { %s19_s13 = sshll.u32 %s280_s12, 4  ;;  %p209_p0 = scmp.ne.s32.totalorder %s360_s1, %s208_s16  ;;  %s20_s13 = int_to_ptr.vmem [resolvable:$true] %s19_s13 }
   0x4   :  { %s210_s21 = scalar_lea.hbm %s360_s1, 1536  ;;  %p212_p2 = scmp.lt.u32.totalorder %s208_s16, %s360_s1 }
   0x5   :  { %p211_p1 = scmp.lt.u32.totalorder %s210_s21, %s208_s16 }
   0x7   :  { %p213_p3 = por %p212_p2, %p211_p1 }
   0x9   :  { %p214_p4 = pnand %p213_p3, %p209_p0 }
   0xb   :  { %217 = shalt.err (!%p214_p4)
}
   0xc   :  { %s218_s24 = scalar_lea.vmem %s20_s13, 1024  ;;  %p223_p6 = scmp.lt.s32.totalorder %s20_s13, %s20_s13 }
   0xd   :  { %p219_p5 = scmp.ne.s32.totalorder %s20_s13, %s218_s24  ;;  %p224_p7 = scmp.lt.s32.totalorder %s218_s24, %s218_s24 }
   0xf   :  { %p225_p8 = por %p224_p7, %p223_p6 }
  0x11   :  { %p226_p9 = pnand %p225_p8, %p219_p5 }
  0x13   :  { %229 = shalt.err (!%p226_p9)
}
  0x14   :  { %s281_s25 = smov 512   ;;  %s282_s26 = smov 32  }
  0x15   :  { %25 = dma.hbm_to_vmem [thread:$0]  %s360_s1, 1024, %s20_s13, [#allocation4], %s281_s25, %s281_s25, %s282_s26  }
  0x16   :  { %s283_s29 = smov [#allocation6]   ;;  %s230_s6 = scalar_lea.hbm %s361_s2, 1024 }
  0x17   :  { %s31_s30 = sshll.u32 %s283_s29, 4  ;;  %p231_p10 = scmp.ne.s32.totalorder %s361_s2, %s230_s6  ;;  %s32_s30 = int_to_ptr.vmem [resolvable:$true] %s31_s30 }
  0x18   :  { %s232_s11 = scalar_lea.hbm %s361_s2, 1536  ;;  %p234_p12 = scmp.lt.u32.totalorder %s230_s6, %s361_s2 }
  0x19   :  { %p233_p11 = scmp.lt.u32.totalorder %s232_s11, %s230_s6 }
  0x1b   :  { %p235_p13 = por %p234_p12, %p233_p11 }
  0x1d   :  { %p236_p0 = pnand %p235_p13, %p231_p10 }
  0x1f   :  { %239 = shalt.err (!%p236_p0)
}
  0x20   :  { %s240_s1 = scalar_lea.vmem %s32_s30, 1024  ;;  %p245_p2 = scmp.lt.s32.totalorder %s32_s30, %s32_s30 }
  0x21   :  { %p241_p1 = scmp.ne.s32.totalorder %s32_s30, %s240_s1  ;;  %p246_p3 = scmp.lt.s32.totalorder %s240_s1, %s240_s1 }
  0x23   :  { %p247_p4 = por %p246_p3, %p245_p2 }
  0x25   :  { %p248_p5 = pnand %p247_p4, %p241_p1 }
  0x27   :  { %251 = shalt.err (!%p248_p5)
}
  0x28   :  { %37 = dma.hbm_to_vmem [thread:$0]  %s361_s2, 1024, %s32_s30, [#allocation7], %s281_s25, %s281_s25, %s282_s26  }
  0x29   :  { %274 = dma.done.wait [#allocation4], 1024  }
  0x2a   :  { %275 = vsyncadd [#allocation4], 4294966272 }
  0x2b   :  { %276 = dma.done.wait [#allocation7], 1024  }
  0x2c   :  { %277 = vsyncadd [#allocation7], 4294966272  ;;  %v74_v0 = vstv %s359_s0  ;;  %v64_v1 = vld [vmem:[#allocation6] sm:$0xff]  ;;  %v65_v3 = vld [vmem:[#allocation6 + $0x8] sm:$0xff]  ;;  %s284_s0 = smov [#allocation8]  }
  0x2d   :  { %v106_v2 = vld [vmem:[#allocation6 + $0x20] sm:$0xff]  ;;  %v75_v4 = vsub.f32 %v64_v1, %v74_v0  ;;  %v76_v6 = vsub.f32 %v65_v3, %v74_v0  ;;  %v107_v7 = vld [vmem:[#allocation6 + $0x28] sm:$0xff]  ;;  %v66_v8 = vld [vmem:[#allocation6 + $0x10] sm:$0xff]  ;;  %s187_s2 = sshll.u32 %s284_s0, 4  ;;  %s188_s2 = int_to_ptr.vmem [resolvable:$true] %s187_s2 }
  0x2e   :  { %v116_v5 = vsub.f32 %v106_v2, %v74_v0  ;;  %v108_v9 = vld [vmem:[#allocation6 + $0x30] sm:$0xff]  ;;  %v117_v10 = vsub.f32 %v107_v7, %v74_v0  ;;  %v77_v11 = vsub.f32 %v66_v8, %v74_v0  ;;  %v67_v13 = vld [vmem:[#allocation6 + $0x18] sm:$0xff]  ;;  %v70_v26 = vld [vmem:[#allocation3] sm:$0xff]  ;;  %s252_s18 = scalar_lea.vmem %s188_s2, 1536  ;;  %p257_p7 = scmp.lt.s32.totalorder %s188_s2, %s188_s2 }
  0x2f   :  { %v118_v12 = vsub.f32 %v108_v9, %v74_v0  ;;  %v109_v14 = vld [vmem:[#allocation6 + $0x38] sm:$0xff]  ;;  %v78_v16 = vsub.f32 %v67_v13, %v74_v0  ;;  %v87_v18 = vmul.f32 %v75_v4, %v75_v4  ;;  %v88_v22 = vmul.f32 %v76_v6, %v76_v6  ;;  %v112_v27 = vld [vmem:[#allocation3 + $0x20] sm:$0xff]  ;;  %v71_v30 = vld [vmem:[#allocation3 + $0x8] sm:$0xff]  ;;  %p253_p6 = scmp.ne.s32.totalorder %s188_s2, %s252_s18  ;;  %p258_p8 = scmp.lt.s32.totalorder %s252_s18, %s252_s18 }
  0x30   :  { %v124_v15 = vadd.f32 %v116_v5, %v75_v4  ;;  %v119_v17 = vsub.f32 %v109_v14, %v74_v0  ;;  %v125_v19 = vadd.f32 %v117_v10, %v76_v6  ;;  %v128_v21 = vmul.f32 %v116_v5, %v116_v5  ;;  %v113_v31 = vld [vmem:[#allocation3 + $0x28] sm:$0xff]  ;;  %v72_v35 = vld [vmem:[#allocation3 + $0x10] sm:$0xff]  ;;  %v73_v43 = vld [vmem:[#allocation3 + $0x18] sm:$0xff] }
  0x31   :  { %v126_v20 = vadd.f32 %v118_v12, %v77_v11  ;;  %v129_v24 = vmul.f32 %v117_v10, %v117_v10  ;;  %v89_v25 = vmul.f32 %v77_v11, %v77_v11  ;;  %v130_v29 = vmul.f32 %v118_v12, %v118_v12  ;;  %v114_v39 = vld [vmem:[#allocation3 + $0x30] sm:$0xff]  ;;  %v115_v44 = vld [vmem:[#allocation3 + $0x38] sm:$0xff]  ;;  %p259_p9 = por %p258_p8, %p257_p7 }
  0x32   :  { %v127_v23 = vadd.f32 %v119_v17, %v78_v16  ;;  %v132_v28 = vadd.f32 %v128_v21, %v87_v18  ;;  %152 = vst [vmem:[#allocation8] sm:$0xff] %v124_v15  ;;  %v90_v33 = vmul.f32 %v78_v16, %v78_v16  ;;  %v131_v34 = vmul.f32 %v119_v17, %v119_v17 }
  0x33   :  { %v133_v32 = vadd.f32 %v129_v24, %v88_v22  ;;  %153 = vst [vmem:[#allocation8 + $0x8] sm:$0xff] %v125_v19  ;;  %154 = vst [vmem:[#allocation8 + $0x10] sm:$0xff] %v126_v20  ;;  %v134_v36 = vadd.f32 %v130_v29, %v89_v25  ;;  %v79_v37 = vsub.f32 %v70_v26, %v64_v1  ;;  %p260_p10 = pnand %p259_p9, %p253_p6 }
  0x34   :  { %v120_v38 = vsub.f32 %v112_v27, %v106_v2  ;;  %155 = vst [vmem:[#allocation8 + $0x18] sm:$0xff] %v127_v23  ;;  %v135_v40 = vadd.f32 %v131_v34, %v90_v33  ;;  %v80_v41 = vsub.f32 %v71_v30, %v65_v3  ;;  %v121_v42 = vsub.f32 %v113_v31, %v107_v7 }
  0x35   :  { %165 = vst [vmem:[#allocation8 + $0x20] sm:$0xff] %v132_v28  ;;  %v95_v45 = vmul.f32 %v79_v37, %v79_v37  ;;  %v81_v47 = vsub.f32 %v72_v35, %v66_v8  ;;  %166 = vst [vmem:[#allocation8 + $0x28] sm:$0xff] %v133_v32  ;;  %v122_v50 = vsub.f32 %v114_v39, %v108_v9 }
  0x36   :  { %v136_v46 = vmul.f32 %v120_v38, %v120_v38  ;;  %v96_v48 = vmul.f32 %v80_v41, %v80_v41  ;;  %v137_v49 = vmul.f32 %v121_v42, %v121_v42  ;;  %167 = vst [vmem:[#allocation8 + $0x30] sm:$0xff] %v134_v36  ;;  %v82_v53 = vsub.f32 %v73_v43, %v67_v13 }
  0x37   :  { %v97_v52 = vmul.f32 %v81_v47, %v81_v47  ;;  %v123_v54 = vsub.f32 %v115_v44, %v109_v14  ;;  %168 = vst [vmem:[#allocation8 + $0x38] sm:$0xff] %v135_v40  ;;  %v138_v56 = vmul.f32 %v122_v50, %v122_v50 }
  0x38   :  { %v140_v51 = vadd.f32 %v136_v46, %v95_v45  ;;  %v141_v55 = vadd.f32 %v137_v49, %v96_v48  ;;  %v98_v57 = vmul.f32 %v82_v53, %v82_v53 }
  0x39   :  { %v139_v58 = vmul.f32 %v123_v54, %v123_v54  ;;  %v142_v59 = vadd.f32 %v138_v56, %v97_v52 }
  0x3a   :  { %178 = vst [vmem:[#allocation8 + $0x40] sm:$0xff] %v140_v51  ;;  %179 = vst [vmem:[#allocation8 + $0x48] sm:$0xff] %v141_v55 }
  0x3b   :  { %v143_v60 = vadd.f32 %v139_v58, %v98_v57  ;;  %180 = vst [vmem:[#allocation8 + $0x50] sm:$0xff] %v142_v59 }
  0x3d   :  { %181 = vst [vmem:[#allocation8 + $0x58] sm:$0xff] %v143_v60 }
  0x3e   :  { %263 = shalt.err (!%p260_p10)
}
  0x3f   :  { %s264_s21 = scalar_lea.hbm %s362_s3, 1536 }
  0x40   :  { %p265_p11 = scmp.ne.s32.totalorder %s362_s3, %s264_s21  ;;  %p268_p12 = scmp.lt.u32.totalorder %s264_s21, %s362_s3 }
  0x42   :  { %p270_p13 = pnand %p268_p12, %p265_p11 }
  0x44   :  { %273 = shalt.err (!%p270_p13)
}
  0x45   :  { %193 = dma.vmem_to_hbm [thread:$0]  %s188_s2, 1536, %s362_s3, [#allocation5], %s281_s25, %s281_s25, %s282_s26  }
  0x46   :  { %278 = dma.done.wait [#allocation5], 1536  }
  0x47   :  { %279 = vsyncadd [#allocation5], 4294965760 }
  0x48   :  { %197 = vsyncpa [#allocation4], 1 }
  0x49   :  { %198 = vsyncpa [#allocation7], 1 }
  0x4a   :  { %199 = vsyncpa [#allocation5], 1 }

</bundles_post_ra>
